<compile_context>
chip_gen: v7x
topology: tpu7x:2x2x1
jax: 0.10.0
libtpu: 0.0.40
codegen_flags: <defaults>
</compile_context>

<pallas_src>
import functools

import jax
import jax.numpy as jnp
import numpy as np
from jax.experimental import pallas as pl
from jax.experimental.pallas import tpu as pltpu


def _round_up(n, m):
    return ((n + m - 1) // m) * m


def actor_kernel(x_ref, w1_ref, b1_ref, w2_ref, b2_ref, wh_ref, bh_ref,
                 out_ref, *, act_lim, act_dim):
    # bf16 operands feed the MXU; accumulation + epilogue stay in f32.
    x = x_ref[...]                                                   # bf16 [TB, obs]

    # Hidden layer 1: Linear + ReLU
    h1 = jnp.dot(x, w1_ref[...], preferred_element_type=jnp.float32) + b1_ref[...]
    h1 = jnp.maximum(h1, 0.0)

    # Hidden layer 2: Linear + ReLU
    h2 = jnp.dot(h1.astype(jnp.bfloat16), w2_ref[...],
                 preferred_element_type=jnp.float32) + b2_ref[...]
    h2 = jnp.maximum(h2, 0.0)

    # Fused heads: one matmul produces [TB, OUT_P] = [mu_lin | sg_lin | pad].
    heads = jnp.dot(h2.astype(jnp.bfloat16), wh_ref[...],
                    preferred_element_type=jnp.float32) + bh_ref[...]

    # Lane select instead of lane slicing: lanes [0, act_dim) -> tanh path,
    # lanes >= act_dim -> softplus path (padding lanes discarded outside).
    # One lane-dense store of the full [TB, OUT_P] slab.
    lane = jax.lax.broadcasted_iota(jnp.int32, heads.shape, 1)
    mu_part = act_lim * jnp.tanh(heads)
    # Numerically stable softplus: max(x,0) + log1p(exp(-|x|))  (== torch Softplus)
    sp_part = jnp.maximum(heads, 0.0) + jnp.log1p(jnp.exp(-jnp.abs(heads)))
    out_ref[...] = jnp.where(lane < act_dim, mu_part, sp_part)


def _vmem_limit_bytes(tb, obs_dim, h1, h2, out_f):
    """Conservative per-call VMEM budget (fits v7x's 64 MiB physical VMEM)."""
    x_buf = 2 * tb * obs_dim * 2           # bf16 input tile, double-buffered
    out_buf = 2 * tb * out_f * 4           # f32 fused-output tile, double-buffered
    weights = (obs_dim * h1 + h1 * h2 + h2 * out_f) * 2 \
        + (h1 + h2 + out_f) * 4            # resident params (bf16 W, f32 b)
    live = tb * (h1 + h2 + out_f) * 4      # live f32 intermediates
    need = x_buf + out_buf + 2 * weights + 2 * live
    return int(min(max(2 * need, 8 * 1024 * 1024), 48 * 1024 * 1024))


def actor_forward(x, params, act_lim, *, block_batch=512):
    """Run the Actor forward pass as one batch-tiled Pallas kernel."""
    x = jnp.asarray(x, jnp.float32)
    batch, obs_dim = x.shape
    h1 = params["w1"].shape[1]
    h2 = params["w2"].shape[1]
    act_dim = params["w_mu"].shape[1]
    out_f = 2 * act_dim
    out_p = _round_up(out_f, 128)          # lane-dense output slab width

    # Fuse the two heads into a single [h2, out_p] matmul (zero-padded lanes).
    w_head = jnp.concatenate([params["w_mu"], params["w_sg"]], axis=1)
    b_head = jnp.concatenate([params["b_mu"], params["b_sg"]], axis=1)
    if out_p != out_f:
        w_head = jnp.pad(w_head, ((0, 0), (0, out_p - out_f)))
        b_head = jnp.pad(b_head, ((0, 0), (0, out_p - out_f)))

    # Batch tile: >=512 rows for realistic PPO batches; shrink (multiple of 16
    # for bf16 sublane packing) when the whole batch fits in one tile.
    if batch <= block_batch:
        tb = max(16, _round_up(batch, 16))
    else:
        tb = block_batch
    padded = _round_up(batch, tb)
    if padded != batch:
        x = jnp.pad(x, ((0, padded - batch), (0, 0)))
    grid = (padded // tb,)

    # bf16 matmul operands; f32 biases (bias add / activations stay f32).
    x_bf = x.astype(jnp.bfloat16)
    w1 = params["w1"].astype(jnp.bfloat16)
    w2 = params["w2"].astype(jnp.bfloat16)
    wh = w_head.astype(jnp.bfloat16)
    b1 = params["b1"].astype(jnp.float32)
    b2 = params["b2"].astype(jnp.float32)
    bh = b_head.astype(jnp.float32)

    kernel = functools.partial(actor_kernel, act_lim=float(act_lim), act_dim=act_dim)

    flops = 2 * padded * (obs_dim * h1 + h1 * h2 + h2 * out_p)
    bytes_accessed = (padded * obs_dim * 2 + padded * out_p * 4
                      + (obs_dim * h1 + h1 * h2 + h2 * out_p) * 2
                      + (h1 + h2 + out_p) * 4)
    transcendentals = 3 * padded * out_p     # tanh + exp + log1p on the fused head

    out = pl.pallas_call(
        kernel,
        out_shape=jax.ShapeDtypeStruct((padded, out_p), jnp.float32),
        grid=grid,
        in_specs=[
            pl.BlockSpec((tb, obs_dim), lambda i: (i, 0)),   # x tile (pipelined)
            pl.BlockSpec((obs_dim, h1), lambda i: (0, 0)),   # resident weights/biases
            pl.BlockSpec((1, h1), lambda i: (0, 0)),
            pl.BlockSpec((h1, h2), lambda i: (0, 0)),
            pl.BlockSpec((1, h2), lambda i: (0, 0)),
            pl.BlockSpec((h2, out_p), lambda i: (0, 0)),
            pl.BlockSpec((1, out_p), lambda i: (0, 0)),
        ],
        out_specs=pl.BlockSpec((tb, out_p), lambda i: (i, 0)),
        compiler_params=pltpu.CompilerParams(
            dimension_semantics=("parallel",),
            vmem_limit_bytes=_vmem_limit_bytes(tb, obs_dim, h1, h2, out_p),
        ),
        cost_estimate=pl.CostEstimate(
            flops=flops,
            transcendentals=transcendentals,
            bytes_accessed=bytes_accessed,
        ),
    )(x_bf, w1, b1, w2, b2, wh, bh)

    mu = out[:batch, :act_dim]
    sigma = out[:batch, act_dim:out_f]
    return mu, sigma


def init_actor_params(key, obs_dim, act_dim, layers_size):
    """PyTorch-style uniform(-1/sqrt(fan_in), 1/sqrt(fan_in)) init.

    Weights stored as [in_features, out_features]; biases as [1, out]."""
    def linear(k, fan_in, fan_out):
        kw, kb = jax.random.split(k)
        bound = 1.0 / np.sqrt(fan_in)
        w = jax.random.uniform(kw, (fan_in, fan_out), jnp.float32, -bound, bound)
        b = jax.random.uniform(kb, (1, fan_out), jnp.float32, -bound, bound)
        return w, b

    k1, k2, k3, k4 = jax.random.split(key, 4)
    w1, b1 = linear(k1, obs_dim, layers_size[0])
    w2, b2 = linear(k2, layers_size[0], layers_size[1])
    wmu, bmu = linear(k3, layers_size[1], act_dim)
    wsg, bsg = linear(k4, layers_size[1], act_dim)
    return {
        "w1": w1, "b1": b1,
        "w2": w2, "b2": b2,
        "w_mu": wmu, "b_mu": bmu,
        "w_sg": wsg, "b_sg": bsg,
    }


def actor_forward_ref(x, params, act_lim):
    """Pure-f32 JAX reference (exact PyTorch semantics)."""
    h1 = jax.nn.relu(x @ params["w1"] + params["b1"])
    h2 = jax.nn.relu(h1 @ params["w2"] + params["b2"])
    mu = act_lim * jnp.tanh(h2 @ params["w_mu"] + params["b_mu"])
    sigma = jax.nn.softplus(h2 @ params["w_sg"] + params["b_sg"])
    return mu, sigma


def actor_forward_ref_bf16(x, params, act_lim):
    """Reference mirroring the kernel numerics: bf16 matmul operands, f32 accum."""
    def mm(a, w):
        return jnp.dot(a.astype(jnp.bfloat16), w.astype(jnp.bfloat16),
                       preferred_element_type=jnp.float32)
    h1 = jax.nn.relu(mm(x, params["w1"]) + params["b1"])
    h2 = jax.nn.relu(mm(h1, params["w2"]) + params["b2"])
    mu = act_lim * jnp.tanh(mm(h2, params["w_mu"]) + params["b_mu"])
    sigma = jax.nn.softplus(mm(h2, params["w_sg"]) + params["b_sg"])
    return mu, sigma


if __name__ == "__main__":
    # Small shapes consistent with the module's forward pass.
    batch = 8
    obs_dim = 32
    layers_size = (64, 64)
    act_dim = 8
    act_lim = 2.0

    key = jax.random.PRNGKey(0)
    k_params, k_x = jax.random.split(key)
    params = init_actor_params(k_params, obs_dim, act_dim, layers_size)
    x = jax.random.normal(k_x, (batch, obs_dim), jnp.float32)

    mu, sigma = actor_forward(x, params, act_lim)
    mu, sigma = jax.block_until_ready((mu, sigma))

    # Tight check against a reference with matching (bf16-operand) numerics.
    mu_m, sg_m = actor_forward_ref_bf16(x, params, act_lim)
    np.testing.assert_allclose(np.asarray(mu), np.asarray(mu_m), atol=1e-4, rtol=1e-4)
    np.testing.assert_allclose(np.asarray(sigma), np.asarray(sg_m), atol=1e-4, rtol=1e-4)

    # Loose sanity check against the pure-f32 PyTorch-equivalent reference.
    mu_f, sg_f = actor_forward_ref(x, params, act_lim)
    np.testing.assert_allclose(np.asarray(mu), np.asarray(mu_f), atol=5e-2, rtol=5e-2)
    np.testing.assert_allclose(np.asarray(sigma), np.asarray(sg_f), atol=5e-2, rtol=5e-2)

    print("KERNEL_OK")
</pallas_src>

<mosaic_0001>
module attributes {stable_mosaic.version = 11 : i64} {
  func.func @actor_kernel(%arg0: i32, %arg1: memref<16x32xbf16, #tpu.memory_space<vmem>>, %arg2: memref<32x64xbf16, #tpu.memory_space<vmem>>, %arg3: memref<1x64xf32, #tpu.memory_space<vmem>>, %arg4: memref<64x64xbf16, #tpu.memory_space<vmem>>, %arg5: memref<1x64xf32, #tpu.memory_space<vmem>>, %arg6: memref<64x128xbf16, #tpu.memory_space<vmem>>, %arg7: memref<1x128xf32, #tpu.memory_space<vmem>>, %arg8: memref<16x128xf32, #tpu.memory_space<vmem>>) attributes {dimension_semantics = [#tpu.dimension_semantics<parallel>], iteration_bounds = array<i64: 1>, scalar_prefetch = 0 : i64, scratch_operands = 0 : i64, tpu.core_type = #tpu.core_type<tc>, window_params = [{transform_indices = @transform_0, window_bounds = array<i64: 16, 32>}, {pipeline_mode = #tpu.pipeline_mode<synchronous>, transform_indices = @transform_1, window_bounds = array<i64: 32, 64>}, {pipeline_mode = #tpu.pipeline_mode<synchronous>, transform_indices = @transform_2, window_bounds = array<i64: 1, 64>}, {pipeline_mode = #tpu.pipeline_mode<synchronous>, transform_indices = @transform_3, window_bounds = array<i64: 64, 64>}, {pipeline_mode = #tpu.pipeline_mode<synchronous>, transform_indices = @transform_4, window_bounds = array<i64: 1, 64>}, {pipeline_mode = #tpu.pipeline_mode<synchronous>, transform_indices = @transform_5, window_bounds = array<i64: 64, 128>}, {pipeline_mode = #tpu.pipeline_mode<synchronous>, transform_indices = @transform_6, window_bounds = array<i64: 1, 128>}, {transform_indices = @transform_7, window_bounds = array<i64: 16, 128>}]} {
    %c0 = arith.constant 0 : index
    %c0_0 = arith.constant 0 : index
    %0 = vector.load %arg1[%c0, %c0_0] : memref<16x32xbf16, #tpu.memory_space<vmem>>, vector<16x32xbf16>
    %c0_1 = arith.constant 0 : index
    %c0_2 = arith.constant 0 : index
    %1 = vector.load %arg2[%c0_1, %c0_2] : memref<32x64xbf16, #tpu.memory_space<vmem>>, vector<32x64xbf16>
    %cst = arith.constant dense<0.000000e+00> : vector<16x64xf32>
    %2 = tpu.matmul %0, %1, %cst {dimension_numbers = #tpu.dot_dimension_numbers<[1], [0], [0], [1], [0, 0, 1, 1], [], []>} : vector<16x32xbf16>, vector<32x64xbf16>, vector<16x64xf32> -> vector<16x64xf32>
    %c0_3 = arith.constant 0 : index
    %c0_4 = arith.constant 0 : index
    %3 = vector.load %arg3[%c0_3, %c0_4] : memref<1x64xf32, #tpu.memory_space<vmem>>, vector<1x64xf32>
    %4 = vector.broadcast %3 : vector<1x64xf32> to vector<16x64xf32>
    %5 = arith.addf %2, %4 : vector<16x64xf32>
    %cst_5 = arith.constant 0.000000e+00 : f32
    %6 = vector.broadcast %cst_5 : f32 to vector<16x64xf32>
    %7 = arith.maximumf %5, %6 : vector<16x64xf32>
    %8 = arith.truncf %7 : vector<16x64xf32> to vector<16x64xbf16>
    %c0_6 = arith.constant 0 : index
    %c0_7 = arith.constant 0 : index
    %9 = vector.load %arg4[%c0_6, %c0_7] : memref<64x64xbf16, #tpu.memory_space<vmem>>, vector<64x64xbf16>
    %cst_8 = arith.constant dense<0.000000e+00> : vector<16x64xf32>
    %10 = tpu.matmul %8, %9, %cst_8 {dimension_numbers = #tpu.dot_dimension_numbers<[1], [0], [0], [1], [0, 0, 1, 1], [], []>} : vector<16x64xbf16>, vector<64x64xbf16>, vector<16x64xf32> -> vector<16x64xf32>
    %c0_9 = arith.constant 0 : index
    %c0_10 = arith.constant 0 : index
    %11 = vector.load %arg5[%c0_9, %c0_10] : memref<1x64xf32, #tpu.memory_space<vmem>>, vector<1x64xf32>
    %12 = vector.broadcast %11 : vector<1x64xf32> to vector<16x64xf32>
    %13 = arith.addf %10, %12 : vector<16x64xf32>
    %cst_11 = arith.constant 0.000000e+00 : f32
    %14 = vector.broadcast %cst_11 : f32 to vector<16x64xf32>
    %15 = arith.maximumf %13, %14 : vector<16x64xf32>
    %16 = arith.truncf %15 : vector<16x64xf32> to vector<16x64xbf16>
    %c0_12 = arith.constant 0 : index
    %c0_13 = arith.constant 0 : index
    %17 = vector.load %arg6[%c0_12, %c0_13] : memref<64x128xbf16, #tpu.memory_space<vmem>>, vector<64x128xbf16>
    %cst_14 = arith.constant dense<0.000000e+00> : vector<16x128xf32>
    %18 = tpu.matmul %16, %17, %cst_14 {dimension_numbers = #tpu.dot_dimension_numbers<[1], [0], [0], [1], [0, 0, 1, 1], [], []>} : vector<16x64xbf16>, vector<64x128xbf16>, vector<16x128xf32> -> vector<16x128xf32>
    %c0_15 = arith.constant 0 : index
    %c0_16 = arith.constant 0 : index
    %19 = vector.load %arg7[%c0_15, %c0_16] : memref<1x128xf32, #tpu.memory_space<vmem>>, vector<1x128xf32>
    %20 = vector.broadcast %19 : vector<1x128xf32> to vector<16x128xf32>
    %21 = arith.addf %18, %20 : vector<16x128xf32>
    %22 = tpu.iota {dimensions = array<i32: 1>} : vector<16x128xi32>
    %23 = math.tanh %21 : vector<16x128xf32>
    %cst_17 = arith.constant 2.000000e+00 : f32
    %24 = vector.broadcast %cst_17 : f32 to vector<16x128xf32>
    %25 = arith.mulf %24, %23 : vector<16x128xf32>
    %cst_18 = arith.constant 0.000000e+00 : f32
    %26 = vector.broadcast %cst_18 : f32 to vector<16x128xf32>
    %27 = arith.maximumf %21, %26 : vector<16x128xf32>
    %28 = math.absf %21 : vector<16x128xf32>
    %cst_19 = arith.constant 0.000000e+00 : f32
    %29 = vector.broadcast %cst_19 : f32 to vector<16x128xf32>
    %30 = arith.subf %29, %28 : vector<16x128xf32>
    %31 = math.exp %30 : vector<16x128xf32>
    %32 = math.log1p %31 : vector<16x128xf32>
    %33 = arith.addf %27, %32 : vector<16x128xf32>
    %c8_i32 = arith.constant 8 : i32
    %34 = vector.broadcast %c8_i32 : i32 to vector<16x128xi32>
    %35 = arith.cmpi slt, %22, %34 : vector<16x128xi32>
    %36 = arith.select %35, %25, %33 : vector<16x128xi1>, vector<16x128xf32>
    %c0_20 = arith.constant 0 : index
    %c0_21 = arith.constant 0 : index
    %37 = vector.load %arg8[%c0_20, %c0_21] : memref<16x128xf32, #tpu.memory_space<vmem>>, vector<16x128xf32>
    tpu.vector_store %arg8[%c0_20, %c0_21], %36 {strides = array<i32>} : memref<16x128xf32, #tpu.memory_space<vmem>>, vector<16x128xf32>,
    return
  }
  func.func @transform_0(%arg0: i32) -> (i32, i32) {
    %c0_i32 = arith.constant 0 : i32
    %c0_i32_0 = arith.constant 0 : i32
    return %arg0, %c0_i32 : i32, i32
  }
  func.func @transform_1(%arg0: i32) -> (i32, i32) {
    %c0_i32 = arith.constant 0 : i32
    %c0_i32_0 = arith.constant 0 : i32
    %c0_i32_1 = arith.constant 0 : i32
    return %c0_i32, %c0_i32_0 : i32, i32
  }
  func.func @transform_2(%arg0: i32) -> (i32, i32) {
    %c0_i32 = arith.constant 0 : i32
    %c0_i32_0 = arith.constant 0 : i32
    %c0_i32_1 = arith.constant 0 : i32
    return %c0_i32, %c0_i32_0 : i32, i32
  }
  func.func @transform_3(%arg0: i32) -> (i32, i32) {
    %c0_i32 = arith.constant 0 : i32
    %c0_i32_0 = arith.constant 0 : i32
    %c0_i32_1 = arith.constant 0 : i32
    return %c0_i32, %c0_i32_0 : i32, i32
  }
  func.func @transform_4(%arg0: i32) -> (i32, i32) {
    %c0_i32 = arith.constant 0 : i32
    %c0_i32_0 = arith.constant 0 : i32
    %c0_i32_1 = arith.constant 0 : i32
    return %c0_i32, %c0_i32_0 : i32, i32
  }
  func.func @transform_5(%arg0: i32) -> (i32, i32) {
    %c0_i32 = arith.constant 0 : i32
    %c0_i32_0 = arith.constant 0 : i32
    %c0_i32_1 = arith.constant 0 : i32
    return %c0_i32, %c0_i32_0 : i32, i32
  }
  func.func @transform_6(%arg0: i32) -> (i32, i32) {
    %c0_i32 = arith.constant 0 : i32
    %c0_i32_0 = arith.constant 0 : i32
    %c0_i32_1 = arith.constant 0 : i32
    return %c0_i32, %c0_i32_0 : i32, i32
  }
  func.func @transform_7(%arg0: i32) -> (i32, i32) {
    %c0_i32 = arith.constant 0 : i32
    %c0_i32_0 = arith.constant 0 : i32
    return %arg0, %c0_i32 : i32, i32
  }
}

</mosaic_0001>

<bundles_post_ra>
// kernel: tpu_custom_call.1
= control target key start
LH: loop header
LB: loop body
LE: loop exit
PB: predicated region body
PF: predicated region fallthrough
CT: control target
= control target key end

     0   :  { %12 = vsyncpa [#allocation3], 0  ;;  %s756_s0 = inlined_call_operand.hbm [shape: bf16[16,32], index: 0, kind: input, shape index: {}]   ;;  %s757_s1 = inlined_call_operand.hbm [shape: bf16[32,64], index: 1, kind: input, shape index: {}]   ;;  %s758_s2 = inlined_call_operand.vmem [shape: f32[1,64], index: 2, kind: input, shape index: {}]   ;;  %s759_s3 = inlined_call_operand.hbm [shape: bf16[64,64], index: 3, kind: input, shape index: {}]   ;;  %s760_s4 = inlined_call_operand.vmem [shape: f32[1,64], index: 4, kind: input, shape index: {}]   ;;  %s761_s5 = inlined_call_operand.hbm [shape: bf16[64,128], index: 5, kind: input, shape index: {}]   ;;  %s762_s6 = inlined_call_operand.vmem [shape: f32[1,128], index: 6, kind: input, shape index: {}]   ;;  %s763_s7 = inlined_call_operand.hbm [shape: f32[16,128], index: 7, kind: output, shape index: {}]  }
   0x1   :  { %13 = vsyncpa [#allocation6], 0 }
   0x2   :  { %14 = vsyncpa [#allocation9], 0 }
   0x3   :  { %15 = vsyncpa [#allocation4], 0  ;;  %s605_s24 = smov [#allocation5]   ;;  %s606_s26 = smov [#allocation2]  }
   0x4   :  { %s33_s25 = sshll.u32 %s605_s24, 4  ;;  %s21_s27 = sshll.u32 %s606_s26, 4  ;;  %s34_s25 = int_to_ptr.vmem [resolvable:$true] %s33_s25  ;;  %s656_s27 = int_to_ptr.vmem [resolvable:$true] %s21_s27 }
   0x5   :  { %s487_s30 = scalar_lea.hbm %s757_s1, 256 }
   0x6   :  { %p488_p0 = scmp.ne.s32.totalorder %s757_s1, %s487_s30  ;;  %p491_p1 = scmp.lt.u32.totalorder %s487_s30, %s757_s1 }
   0x8   :  { %p493_p2 = pnand %p491_p1, %p488_p0 }
   0xa   :  { %496 = shalt.err (!%p493_p2)
}
   0xb   :  { %s497_s12 = scalar_lea.vmem %s34_s25, 256  ;;  %p502_p4 = scmp.lt.s32.totalorder %s34_s25, %s34_s25 }
   0xc   :  { %p498_p3 = scmp.ne.s32.totalorder %s34_s25, %s497_s12  ;;  %p503_p5 = scmp.lt.s32.totalorder %s497_s12, %s497_s12 }
   0xe   :  { %p504_p6 = por %p503_p5, %p502_p4 }
  0x10   :  { %p505_p7 = pnand %p504_p6, %p498_p3 }
  0x12   :  { %508 = shalt.err (!%p505_p7)
}
  0x13   :  { %s607_s13 = smov 64   ;;  %s608_s14 = smov 4  }
  0x14   :  { %39 = dma.hbm_to_vmem [thread:$0]  %s757_s1, 256, %s34_s25, [#allocation6], %s607_s13, %s607_s13, %s608_s14  }
  0x15   :  { %s509_s19 = scalar_lea.hbm %s756_s0, 128 }
  0x16   :  { %p510_p8 = scmp.ne.s32.totalorder %s756_s0, %s509_s19  ;;  %p513_p9 = scmp.lt.u32.totalorder %s509_s19, %s756_s0 }
  0x18   :  { %p515_p10 = pnand %p513_p9, %p510_p8 }
  0x1a   :  { %518 = shalt.err (!%p515_p10)
}
  0x1b   :  { %s519_s24 = scalar_lea.vmem %s656_s27, 128  ;;  %p524_p12 = scmp.lt.s32.totalorder %s656_s27, %s656_s27 }
  0x1c   :  { %p520_p11 = scmp.ne.s32.totalorder %s656_s27, %s519_s24  ;;  %p525_p13 = scmp.lt.s32.totalorder %s519_s24, %s519_s24 }
  0x1e   :  { %p526_p0 = por %p525_p13, %p524_p12 }
  0x20   :  { %p527_p1 = pnand %p526_p0, %p520_p11 }
  0x22   :  { %530 = shalt.err (!%p527_p1)
}
  0x23   :  { %27 = dma.hbm_to_vmem [thread:$0]  %s756_s0, 128, %s656_s27, [#allocation3], %s607_s13, %s607_s13, %s608_s14  }
  0x24   :  { %s609_s26 = smov [#allocation7]   ;;  %s610_s29 = smov [#allocation8]  }
  0x25   :  { %s47_s28 = sshll.u32 %s609_s26, 4  ;;  %s61_s30 = sshll.u32 %s610_s29, 4  ;;  %s48_s28 = int_to_ptr.vmem [resolvable:$true] %s47_s28  ;;  %s693_s30 = int_to_ptr.vmem [resolvable:$true] %s61_s30 }
  0x26   :  { %s531_s10 = scalar_lea.hbm %s759_s3, 512 }
  0x27   :  { %p532_p2 = scmp.ne.s32.totalorder %s759_s3, %s531_s10  ;;  %p535_p3 = scmp.lt.u32.totalorder %s531_s10, %s759_s3 }
  0x29   :  { %p537_p4 = pnand %p535_p3, %p532_p2 }
  0x2b   :  { %540 = shalt.err (!%p537_p4)
}
  0x2c   :  { %s541_s0 = scalar_lea.vmem %s48_s28, 512  ;;  %p546_p6 = scmp.lt.s32.totalorder %s48_s28, %s48_s28 }
  0x2d   :  { %p542_p5 = scmp.ne.s32.totalorder %s48_s28, %s541_s0  ;;  %p547_p7 = scmp.lt.s32.totalorder %s541_s0, %s541_s0 }
  0x2f   :  { %p548_p8 = por %p547_p7, %p546_p6 }
  0x31   :  { %p549_p9 = pnand %p548_p8, %p542_p5 }
  0x33   :  { %552 = shalt.err (!%p549_p9)
}
  0x34   :  { %53 = dma.hbm_to_vmem [thread:$0]  %s759_s3, 512, %s48_s28, [#allocation6], %s607_s13, %s607_s13, %s608_s14  }
  0x35   :  { %s553_s20 = scalar_lea.hbm %s761_s5, 512 }
  0x36   :  { %p554_p10 = scmp.ne.s32.totalorder %s761_s5, %s553_s20  ;;  %p557_p11 = scmp.lt.u32.totalorder %s553_s20, %s761_s5 }
  0x38   :  { %p559_p12 = pnand %p557_p11, %p554_p10 }
  0x3a   :  { %562 = shalt.err (!%p559_p12)
}
  0x3b   :  { %s563_s1 = scalar_lea.vmem %s693_s30, 512  ;;  %p568_p0 = scmp.lt.s32.totalorder %s693_s30, %s693_s30 }
  0x3c   :  { %p564_p13 = scmp.ne.s32.totalorder %s693_s30, %s563_s1  ;;  %p569_p1 = scmp.lt.s32.totalorder %s563_s1, %s563_s1 }
  0x3e   :  { %p570_p2 = por %p569_p1, %p568_p0 }
  0x40   :  { %p571_p3 = pnand %p570_p2, %p564_p13 }
  0x42   :  { %574 = shalt.err (!%p571_p3)
}
  0x43   :  { %67 = dma.hbm_to_vmem [thread:$0]  %s761_s5, 512, %s693_s30, [#allocation9], %s607_s13, %s607_s13, %s608_s14  }
  0x44   :  { %597 = dma.done.wait [#allocation3], 128  }
  0x45   :  { %598 = vsyncadd [#allocation3], 4294967168 }
  0x46   :  { %599 = dma.done.wait [#allocation6], 768  }
  0x47   :  { %600 = vsyncadd [#allocation6], 4294966528 }
  0x48   :  { %601 = dma.done.wait [#allocation9], 512  }
  0x49   :  { %602 = vsyncadd [#allocation9], 4294966784  ;;  %v611_v0 = vmov 0.0   ;;  %vm612_vm0 = vmmov 0   ;;  %v464_v1 = vld [vmem:[#allocation5] sm:$0xff]   ;;  %v465_v2 = vld [vmem:[#allocation5 + $0x8] sm:$0xff]   ;;  %v331_v51 = vlaneseq }
  0x4a   :  { %421 = vmatprep.subr.bf16.mxu0 %v611_v0  ;;  %425 = vmatprep.mubr.msk.bf16.mxu0 %vm612_vm0, %v611_v0  ;;  %v467_v3 = vld [vmem:[#allocation7] sm:$0xff]   ;;  %v466_v4 = vld [vmem:[#allocation2] sm:$0xff]   ;;  %vm113_vm1 = vcmask 261120   ;;  %v469_v6 = vld [vmem:[#allocation7 + $0x10] sm:$0xff]   ;;  %vm200_vm2 = vcmask 523264  }
  0x4b   :  { %429 = vmatprep.subr.bf16.mxu1 %v611_v0  ;;  %437 = vmatprep.mubr.msk.bf16.mxu1 %vm612_vm0, %v611_v0  ;;  %v468_v5 = vld [vmem:[#allocation7 + $0x8] sm:$0xff]   ;;  %v470_v7 = vld [vmem:[#allocation7 + $0x18] sm:$0xff]   ;;  %v471_v8 = vld [vmem:[#allocation8] sm:$0xff]   ;;  %v332_v55 = vand.u32 127, %v331_v51 }
  0x4c   :  { %422 = vmatpush3.bf16.msra.mxu0 %v464_v1  ;;  %430 = vmatpush3.bf16.msra.mxu1 %v467_v3  ;;  %v472_v9 = vld [vmem:[#allocation8 + $0x8] sm:$0xff]   ;;  %v473_v20 = vld [vmem:[#allocation8 + $0x10] sm:$0xff]   ;;  %v474_v21 = vld [vmem:[#allocation8 + $0x18] sm:$0xff]  }
  0x4d   :  { %423 = vmatprep.subr.bf16.mxu0 %v611_v0  ;;  %431 = vmatprep.subr.bf16.mxu1 %v611_v0  ;;  %v391_v10 = vld [vmem:[%s758_s2] ss:$0 sm:$0xff]  ;;  %vm367_vm4 = vcmp.lt.s32.totalorder %v332_v55, 8 }
  0x4e   :  { %v396_v22 = vld [vmem:[%s760_s4] ss:$0 sm:$0xff]  ;;  %s613_s4 = smov [#allocation10]  }
  0x4f   :  { %v402_v32 = vld [vmem:[%s762_s6] ss:$0 sm:$0xff]  ;;  %s377_s6 = sshll.u32 %s613_s4, 4  ;;  %s378_s6 = int_to_ptr.vmem [resolvable:$true] %s377_s6 }
  0x50   :  { %424 = vmatpush3.bf16.msra.mxu0 %v465_v2  ;;  %432 = vmatpush3.bf16.msra.mxu1 %v468_v5  ;;  %s575_s29 = scalar_lea.vmem %s378_s6, 256  ;;  %p580_p5 = scmp.lt.s32.totalorder %s378_s6, %s378_s6 }
  0x51   :  { %441 = vmatprep.subr.bf16.mxu0 %v611_v0  ;;  %433 = vmatprep.subr.bf16.mxu1 %v611_v0  ;;  %p576_p4 = scmp.ne.s32.totalorder %s378_s6, %s575_s29  ;;  %p581_p6 = scmp.lt.s32.totalorder %s575_s29, %s575_s29 }
  0x53   :  { %426 = vmatmul.mubr.msk.bf16.vlgmr.msra.gmra.mrb[0].mxu0 %vm113_vm1, %v466_v4  ;;  %p582_p7 = por %p581_p6, %p580_p5 }
  0x54   :  { %449 = vmatprep.mubr.msk.bf16.mxu0 %vm612_vm0, %v611_v0  ;;  %434 = vmatpush3.bf16.msra.mxu1 %v469_v6 }
  0x55   :  { %435 = vmatprep.subr.bf16.mxu1 %v611_v0  ;;  %442 = vmatpush3.bf16.msra.mxu0 %v471_v8  ;;  %p583_p8 = pnand %p582_p7, %p576_p4 }
  0x56   :  { %443 = vmatprep.subr.bf16.mxu0 %v611_v0 }
  0x58   :  { %436 = vmatpush3.bf16.msra.mxu1 %v470_v7 }
  0x59   :  { %444 = vmatpush3.bf16.msra.mxu0 %v472_v9 }
  0x5a   :  { %445 = vmatprep.subr.bf16.mxu0 %v611_v0 }
  0x5d   :  { %446 = vmatpush3.bf16.msra.mxu0 %v473_v20 }
  0x5e   :  { %447 = vmatprep.subr.bf16.mxu0 %v611_v0 }
  0x61   :  { %448 = vmatpush3.bf16.msra.mxu0 %v474_v21 }
 0x126   :  { %v151_v11 = vpop.f32.mrb[0].mxu0 }
 0x127   :  { %v152_v12 = vadd.f32 %v391_v10, %v151_v11  ;;  %v427_v13 = vpop.f32.mrb[1].mxu0 }
 0x128   :  { %v154_v14 = vpop.f32.mrb[2].mxu0 }
 0x129   :  { %v155_v15 = vadd.f32 %v391_v10, %v154_v14  ;;  %v428_v16 = vpop.f32.mrb[3].mxu0  ;;  %v158_v17 = vmax.f32 %v152_v12, 0.0 }
 0x12b   :  { %v159_v18 = vmax.f32 %v155_v15, 0.0 }
 0x12d   :  { %v160_v19 = vpack.c.bf16 %v159_v18, %v158_v17 }
 0x12f   :  { %438 = vmatmul.mubr.msk.bf16.vlgmr.msra.gmra.mrb[0].mxu1 %vm200_vm2, %v160_v19 }
 0x202   :  { %v238_v23 = vpop.f32.mrb[0].mxu1 }
 0x203   :  { %v239_v24 = vadd.f32 %v396_v22, %v238_v23  ;;  %v439_v25 = vpop.f32.mrb[1].mxu1 }
 0x204   :  { %v241_v26 = vpop.f32.mrb[2].mxu1 }
 0x205   :  { %v242_v27 = vadd.f32 %v396_v22, %v241_v26  ;;  %v440_v28 = vpop.f32.mrb[3].mxu1  ;;  %v245_v29 = vmax.f32 %v239_v24, 0.0 }
 0x207   :  { %v246_v30 = vmax.f32 %v242_v27, 0.0 }
 0x209   :  { %v247_v31 = vpack.c.bf16 %v246_v30, %v245_v29 }
 0x20b   :  { %450 = vmatmul.mubr.msk.bf16.vlgmr.msra.gmra.mrb[4].mxu0 %vm200_vm2, %v247_v31 }
 0x2de   :  { %v324_v33 = vpop.f32.mrb[4].mxu0 }
 0x2df   :  { %v325_v34 = vadd.f32 %v402_v32, %v324_v33  ;;  %v451_v35 = vpop.f32.mrb[5].mxu0 }
 0x2e0   :  { %v327_v36 = vpop.f32.mrb[6].mxu0 }
 0x2e1   :  { %v339_v37 = vand.u32 2147483647, %v325_v34  ;;  %v328_v38 = vadd.f32 %v402_v32, %v327_v36  ;;  %v452_v39 = vpop.f32.mrb[7].mxu0  ;;  %v337_v62 = vmax.f32 %v325_v34, 0.0 }
 0x2e3   :  { %v341_v40 = vsub.f32 0.0, %v339_v37  ;;  %v340_v41 = vand.u32 2147483647, %v328_v38  ;;  %v338_v5 = vmax.f32 %v328_v38, 0.0 }
 0x2e5   :  { %v343_v42 = vmul.f32 1.442695, %v341_v40  ;;  %v342_v43 = vsub.f32 0.0, %v340_v41 }
 0x2e7   :  { %475 = vpow2.f32 %v343_v42  ;;  %v345_v44 = vmul.f32 1.442695, %v342_v43 }
 0x2e9   :  { %477 = vpow2.f32 %v345_v44 }
 0x2f1   :  { %v476_v45 = vpop.eup %475 }
 0x2f2   :  { %v347_v46 = vadd.f32 1.0, %v476_v45  ;;  %v350_v49 = vmul.f32 -0.5, %v476_v45  ;;  %v353_v53 = vand.u32 2147483647, %v476_v45 }
 0x2f3   :  { %v478_v47 = vpop.eup %477 }
 0x2f4   :  { %479 = vlog2.f32 %v347_v46  ;;  %v356_v48 = vadd.f32 1.0, %v478_v47  ;;  %v359_v50 = vmul.f32 -0.5, %v478_v47  ;;  %v351_v52 = vadd.f32 1.0, %v350_v49 }
 0x2f5   :  { %481 = vtanh.f32 %v325_v34  ;;  %v362_v57 = vand.u32 2147483647, %v478_v47  ;;  %vm354_vm3 = vcmp.lt.f32.partialorder %v353_v53, 0.0004427343 }
 0x2f6   :  { %483 = vlog2.f32 %v356_v48  ;;  %v360_v54 = vadd.f32 1.0, %v359_v50  ;;  %v352_v60 = vmul.f32 %v476_v45, %v351_v52 }
 0x2f7   :  { %485 = vtanh.f32 %v328_v38  ;;  %vm363_vm5 = vcmp.lt.f32.partialorder %v362_v57, 0.0004427343 }
 0x2f8   :  { %v361_v2 = vmul.f32 %v478_v47, %v360_v54 }
 0x2fe   :  { %v480_v56 = vpop.eup %479 }
 0x2ff   :  { %v482_v58 = vpop.eup %481  ;;  %v349_v59 = vmul.f32 0.6931472, %v480_v56 }
 0x300   :  { %v484_v61 = vpop.eup %483  ;;  %v335_v3 = vmul.f32 2.0, %v482_v58 }
 0x301   :  { %v486_v63 = vpop.eup %485  ;;  %v355_v0 = vsel %vm354_vm3, %v352_v60, %v349_v59  ;;  %v358_v1 = vmul.f32 0.6931472, %v484_v61 }
 0x302   :  { %v365_v4 = vadd.f32 %v355_v0, %v337_v62  ;;  %v336_v7 = vmul.f32 2.0, %v486_v63 }
 0x303   :  { %v364_v6 = vsel %vm363_vm5, %v361_v2, %v358_v1 }
 0x304   :  { %v366_v8 = vadd.f32 %v364_v6, %v338_v5  ;;  %v368_v9 = vsel %vm367_vm4, %v335_v3, %v365_v4 }
 0x305   :  { %370 = vst [vmem:[#allocation10] sm:$0xff] %v368_v9 }
 0x306   :  { %v369_v10 = vsel %vm367_vm4, %v336_v7, %v366_v8 }
 0x307   :  { %371 = vst [vmem:[#allocation10 + $0x8] sm:$0xff] %v369_v10 }
 0x308   :  { %586 = shalt.err (!%p583_p8)
}
 0x309   :  { %s587_s9 = scalar_lea.hbm %s763_s7, 256 }
 0x30a   :  { %p588_p9 = scmp.ne.s32.totalorder %s763_s7, %s587_s9  ;;  %p591_p10 = scmp.lt.u32.totalorder %s587_s9, %s763_s7 }
 0x30c   :  { %p593_p11 = pnand %p591_p10, %p588_p9 }
 0x30e   :  { %596 = shalt.err (!%p593_p11)
}
 0x30f   :  { %s614_s16 = smov 128   ;;  %s615_s0 = smov 8  }
 0x310   :  { %383 = dma.vmem_to_hbm [thread:$0]  %s378_s6, 256, %s763_s7, [#allocation4], %s614_s16, %s614_s16, %s615_s0  }
 0x311   :  { %603 = dma.done.wait [#allocation4], 256  }
 0x312   :  { %604 = vsyncadd [#allocation4], 4294967040 }
 0x313   :  { %387 = vsyncpa [#allocation3], 1 }
 0x314   :  { %388 = vsyncpa [#allocation6], 1 }
 0x315   :  { %389 = vsyncpa [#allocation9], 1 }
 0x316   :  { %390 = vsyncpa [#allocation4], 1 }

</bundles_post_ra>
